<compile_context>
chip_gen: v5e
topology: v5e:2x2
jax: 0.10.0
libtpu: 0.0.40
codegen_flags: <defaults>
</compile_context>

<pallas_src>
import functools

import jax
import jax.numpy as jnp
from jax.experimental import pallas as pl
from jax.experimental.pallas import tpu as pltpu


# --------------------------------------------------------------------------- #
# Kernel
# --------------------------------------------------------------------------- #
def policy_kernel(state_ref, w1_ref, b1_ref, w2_ref, b2_ref,
                  wh_ref, bh_ref, scale_ref, out_ref, *,
                  act_dim, bf16_act, lane_dense):
    def hidden_act(z_f32):
        # Hidden-layer tanh.  On v6e/v7x the EUP has a bf16 datapath (2 rows per
        # sublane -> half the EUP pushes); on v5e keep tanh in f32 and only cast
        # for the next MXU matmul (which wants bf16 operands either way).
        if bf16_act:
            return jnp.tanh(z_f32.astype(jnp.bfloat16))
        return jnp.tanh(z_f32).astype(jnp.bfloat16)

    x = state_ref[...].astype(jnp.bfloat16)          # no-op if caller passed bf16

    # hidden layer 1/2: tanh(x @ W + b), bias add + accumulation in f32.
    h1 = hidden_act(jnp.dot(x, w1_ref[...],
                            preferred_element_type=jnp.float32) + b1_ref[...])
    h2 = hidden_act(jnp.dot(h1, w2_ref[...],
                            preferred_element_type=jnp.float32) + b2_ref[...])

    # Fused [mu | sigma] head: a single (H, 2*act_dim) matmul, f32 accumulate.
    heads = jnp.dot(h2, wh_ref[...],
                    preferred_element_type=jnp.float32) + bh_ref[...]

    # Whole-slab epilogue selected by a column mask (pure VPU/EUP work; no
    # lane-unaligned slices or concatenation -> no XLU relayouts).
    col = jax.lax.broadcasted_iota(jnp.int32, heads.shape, 1)
    mu_all = scale_ref[...] * jnp.tanh(heads)                        # f32
    softplus = jnp.maximum(heads, 0.0) + jnp.log1p(jnp.exp(-jnp.abs(heads)))
    sig_all = 10.0 * softplus + 1e-12
    out = jnp.where(col < act_dim, mu_all, sig_all)

    if lane_dense:
        # Repack (tile_b, 2*act_dim) -> (tile_b*2*act_dim/128, 128): full-width
        # unmasked stores and a contiguous HBM writeback (row-major preserving).
        out_ref[...] = out.reshape(out_ref.shape)
    else:
        out_ref[...] = out


# --------------------------------------------------------------------------- #
# Wrapper helpers
# --------------------------------------------------------------------------- #
def _round_up(x, m):
    return ((x + m - 1) // m) * m


def _pick_tile_b(batch, cap):
    """Multiple-of-8 batch tile; big tiles, but >= 2 grid steps when batch allows
    so that the 'parallel' batch axis actually feeds both TensorCores on v7x."""
    cap = 4096 if cap is None else cap
    cap = max(8, min(cap, batch))
    if batch <= 8:
        return batch                                   # single full-extent block
    tile = min(cap, _round_up(pl.cdiv(batch, 2), 8))
    if tile >= batch:
        return batch
    return _round_up(tile, 8)


def _bf16_activations_default():
    try:
        kind = jax.devices()[0].device_kind.lower()
    except Exception:
        return False
    # bf16 VPU/EUP datapath exists on v6e/v7x; v5e (and older) stay f32.
    return ("v6" in kind) or ("v7" in kind) or ("7x" in kind)


def _pallas_forward(state, params, tile_b, lane_dense, bf16_act):
    B, obs_dim = state.shape
    H = params["w1"].shape[1]
    act2 = params["w_heads"].shape[1]
    act_dim = act2 // 2

    grid = (pl.cdiv(B, tile_b),)
    batch_map = lambda i: (i, 0)            # stream batch tiles
    resident = lambda i: (0, 0)             # weights/biases stay put in VMEM

    if lane_dense:
        pack = 128 // act2                  # batch rows packed per 128-lane row
        out_shape = jax.ShapeDtypeStruct((B // pack, 128), jnp.float32)
        out_spec = pl.BlockSpec((tile_b // pack, 128), batch_map)
    else:
        out_shape = jax.ShapeDtypeStruct((B, act2), jnp.float32)
        out_spec = pl.BlockSpec((tile_b, act2), batch_map)

    # Advisory cost hint so XLA can overlap the call with the rest of the PPO step.
    flops = 2 * B * (obs_dim * H + H * H + H * act2)
    transcendentals = B * (2 * H + 3 * act2)
    bytes_accessed = int(
        state.size * state.dtype.itemsize
        + B * act2 * 4
        + sum(int(v.size) * v.dtype.itemsize for v in params.values()))

    return pl.pallas_call(
        functools.partial(policy_kernel, act_dim=act_dim,
                          bf16_act=bf16_act, lane_dense=lane_dense),
        out_shape=out_shape,
        grid_spec=pltpu.PrefetchScalarGridSpec(
            num_scalar_prefetch=0,
            grid=grid,
            in_specs=[
                pl.BlockSpec((tile_b, obs_dim), batch_map),
                pl.BlockSpec(params["w1"].shape, resident),
                pl.BlockSpec(params["b1"].shape, resident),
                pl.BlockSpec(params["w2"].shape, resident),
                pl.BlockSpec(params["b2"].shape, resident),
                pl.BlockSpec(params["w_heads"].shape, resident),
                pl.BlockSpec(params["b_heads"].shape, resident),
                pl.BlockSpec(params["scale_heads"].shape, resident),
            ],
            out_specs=out_spec,
        ),
        compiler_params=pltpu.CompilerParams(
            dimension_semantics=("parallel",)),
        cost_estimate=pl.CostEstimate(
            flops=flops,
            transcendentals=transcendentals,
            bytes_accessed=bytes_accessed),
    )(
        state,
        params["w1"], params["b1"],
        params["w2"], params["b2"],
        params["w_heads"], params["b_heads"],
        params["scale_heads"],
    )


def policy_forward(state, params, *, tile_b=None, bf16_act=None):
    """PolicyNetwork forward.  state: (B, obs_dim) f32 or bf16 -> (mu, sigma), each (B, act_dim) f32."""
    B, _ = state.shape
    act2 = params["w_heads"].shape[1]
    act_dim = act2 // 2

    tile_b = _pick_tile_b(B, tile_b)
    if bf16_act is None:
        bf16_act = _bf16_activations_default()

    # Lane-dense packed output is only exact when batch rows tile cleanly into
    # 128-lane rows and every output block satisfies the (8,128) rule.
    pack_ok = (128 % act2 == 0)
    pack = (128 // act2) if pack_ok else 1
    lane_dense = (
        pack_ok
        and B % pack == 0
        and tile_b % pack == 0
        and ((tile_b // pack) % 8 == 0 or tile_b == B)
    )

    out = None
    if lane_dense:
        try:
            out = _pallas_forward(state, params, tile_b, True, bf16_act)
            out = out.reshape(B, act2)        # row-major view, no data movement
        except Exception:
            out = None                        # fall back to the 8-lane output path
    if out is None:
        out = _pallas_forward(state, params, tile_b, False, bf16_act)

    return out[:, :act_dim], out[:, act_dim:]


# --------------------------------------------------------------------------- #
# Synthetic params + pure-JAX references
# --------------------------------------------------------------------------- #
def make_params(key, obs_dim, n_neurons, act_dim):
    """Deterministic synthetic parameters (same shapes as the PyTorch module)."""
    ks = jax.random.split(key, 8)

    def lin(kw, kb, fan_in, fan_out):
        # emulate nn.Linear default init: U(-1/sqrt(fan_in), 1/sqrt(fan_in))
        bound = 1.0 / jnp.sqrt(fan_in)
        w = jax.random.uniform(kw, (fan_in, fan_out), jnp.float32, -bound, bound)
        b = jax.random.uniform(kb, (1, fan_out), jnp.float32, -bound, bound)
        return w, b

    w1, b1 = lin(ks[0], ks[1], obs_dim, n_neurons)
    w2, b2 = lin(ks[2], ks[3], n_neurons, n_neurons)
    w_mu, b_mu = lin(ks[4], ks[5], n_neurons, act_dim)
    w_sig, b_sig = lin(ks[6], ks[7], n_neurons, act_dim)

    # env.action_space.high -> fixed synthetic scaling (e.g. 2.0 like Pendulum)
    action_scaling = jnp.full((1, act_dim), 2.0, dtype=jnp.float32)

    return {
        # bf16 weight storage (MXU-native on all generations), f32 biases.
        "w1": w1.astype(jnp.bfloat16), "b1": b1,
        "w2": w2.astype(jnp.bfloat16), "b2": b2,
        # fused [mu | sigma] head.
        "w_heads": jnp.concatenate([w_mu, w_sig], axis=1).astype(jnp.bfloat16),
        "b_heads": jnp.concatenate([b_mu, b_sig], axis=1),
        "action_scaling": action_scaling,
        # [scale | 1]: multiplies the whole fused-head slab inside the kernel;
        # the sigma half is masked out by the column select, so its value is moot.
        "scale_heads": jnp.concatenate(
            [action_scaling, jnp.ones_like(action_scaling)], axis=1),
    }


def policy_forward_ref_mixed(state, p, bf16_act):
    """Pure-JAX reference with the same mixed precision as the kernel."""
    act = p["w_heads"].shape[1] // 2

    def act_fn(z):
        if bf16_act:
            return jnp.tanh(z.astype(jnp.bfloat16))
        return jnp.tanh(z).astype(jnp.bfloat16)

    x = state.astype(jnp.bfloat16)
    h1 = act_fn(jnp.dot(x, p["w1"], preferred_element_type=jnp.float32) + p["b1"])
    h2 = act_fn(jnp.dot(h1, p["w2"], preferred_element_type=jnp.float32) + p["b2"])
    heads = jnp.dot(h2, p["w_heads"],
                    preferred_element_type=jnp.float32) + p["b_heads"]
    mu = p["action_scaling"] * jnp.tanh(heads[:, :act])
    sig = 10.0 * jax.nn.softplus(heads[:, act:]) + 1e-12
    return mu, sig


def policy_forward_ref_f32(state, p):
    """Full-f32 reference (the PyTorch module's math), looser sanity check."""
    w1 = p["w1"].astype(jnp.float32)
    w2 = p["w2"].astype(jnp.float32)
    wh = p["w_heads"].astype(jnp.float32)
    act = wh.shape[1] // 2
    x = jnp.tanh(state @ w1 + p["b1"])
    x = jnp.tanh(x @ w2 + p["b2"])
    heads = x @ wh + p["b_heads"]
    mu = p["action_scaling"] * jnp.tanh(heads[:, :act])
    sig = 10.0 * jax.nn.softplus(heads[:, act:]) + 1e-12
    return mu, sig


# TODO(synk): select_action()'s MultivariateNormal sampling / log_prob is host-side
# control logic with no clean Pallas equivalent; only forward() is implemented.

if __name__ == "__main__":
    key = jax.random.PRNGKey(0)
    k_state, k_params = jax.random.split(key)

    # Pendulum-like shapes: obs=16, hidden=64, act=4.  B=256 with the default
    # tile picker gives a 2-step batch grid (128 rows/tile) and exercises the
    # lane-dense packed output path (2*act_dim=8 -> 16 batch rows per 128 lanes).
    B, OBS_DIM, N_NEURONS, ACT_DIM = 256, 16, 64, 4

    state = jax.random.normal(k_state, (B, OBS_DIM), dtype=jnp.float32)
    params = make_params(k_params, OBS_DIM, N_NEURONS, ACT_DIM)

    bf16_act = _bf16_activations_default()
    mu, sig = policy_forward(state, params, bf16_act=bf16_act)
    jax.block_until_ready((mu, sig))
    assert mu.shape == (B, ACT_DIM) and sig.shape == (B, ACT_DIM)

    # Check vs a reference with identical mixed precision.
    mu_m, sig_m = policy_forward_ref_mixed(state, params, bf16_act)
    assert jnp.allclose(mu, mu_m, atol=5e-2, rtol=5e-2)
    assert jnp.allclose(sig, sig_m, atol=5e-2, rtol=5e-2)

    # Loose check vs the full-f32 module math (bf16 operands widen the tolerance).
    mu_f, sig_f = policy_forward_ref_f32(state, params)
    assert jnp.allclose(mu, mu_f, atol=2.5e-1, rtol=2.5e-1)
    assert jnp.allclose(sig, sig_f, atol=2.5e-1, rtol=2.5e-1)
    assert bool(jnp.all(sig > 0.0))

    print("KERNEL_OK")
</pallas_src>

<mosaic_0001>
module attributes {stable_mosaic.version = 11 : i64} {
  func.func @policy_kernel(%arg0: i32, %arg1: memref<128x16xf32, #tpu.memory_space<vmem>>, %arg2: memref<16x64xbf16, #tpu.memory_space<vmem>>, %arg3: memref<1x64xf32, #tpu.memory_space<vmem>>, %arg4: memref<64x64xbf16, #tpu.memory_space<vmem>>, %arg5: memref<1x64xf32, #tpu.memory_space<vmem>>, %arg6: memref<64x8xbf16, #tpu.memory_space<vmem>>, %arg7: memref<1x8xf32, #tpu.memory_space<vmem>>, %arg8: memref<1x8xf32, #tpu.memory_space<vmem>>, %arg9: memref<8x128xf32, #tpu.memory_space<vmem>>) attributes {dimension_semantics = [#tpu.dimension_semantics<parallel>], iteration_bounds = array<i64: 2>, scalar_prefetch = 0 : i64, scratch_operands = 0 : i64, tpu.core_type = #tpu.core_type<tc>, window_params = [{transform_indices = @transform_0, window_bounds = array<i64: 128, 16>}, {pipeline_mode = #tpu.pipeline_mode<synchronous>, transform_indices = @transform_1, window_bounds = array<i64: 16, 64>}, {pipeline_mode = #tpu.pipeline_mode<synchronous>, transform_indices = @transform_2, window_bounds = array<i64: 1, 64>}, {pipeline_mode = #tpu.pipeline_mode<synchronous>, transform_indices = @transform_3, window_bounds = array<i64: 64, 64>}, {pipeline_mode = #tpu.pipeline_mode<synchronous>, transform_indices = @transform_4, window_bounds = array<i64: 1, 64>}, {pipeline_mode = #tpu.pipeline_mode<synchronous>, transform_indices = @transform_5, window_bounds = array<i64: 64, 8>}, {pipeline_mode = #tpu.pipeline_mode<synchronous>, transform_indices = @transform_6, window_bounds = array<i64: 1, 8>}, {pipeline_mode = #tpu.pipeline_mode<synchronous>, transform_indices = @transform_7, window_bounds = array<i64: 1, 8>}, {transform_indices = @transform_8, window_bounds = array<i64: 8, 128>}]} {
    %c0 = arith.constant 0 : index
    %c0_0 = arith.constant 0 : index
    %0 = vector.load %arg1[%c0, %c0_0] : memref<128x16xf32, #tpu.memory_space<vmem>>, vector<128x16xf32>
    %1 = arith.truncf %0 : vector<128x16xf32> to vector<128x16xbf16>
    %c0_1 = arith.constant 0 : index
    %c0_2 = arith.constant 0 : index
    %2 = vector.load %arg2[%c0_1, %c0_2] : memref<16x64xbf16, #tpu.memory_space<vmem>>, vector<16x64xbf16>
    %cst = arith.constant dense<0.000000e+00> : vector<128x64xf32>
    %3 = tpu.matmul %1, %2, %cst {dimension_numbers = #tpu.dot_dimension_numbers<[1], [0], [0], [1], [0, 0, 1, 1], [], []>} : vector<128x16xbf16>, vector<16x64xbf16>, vector<128x64xf32> -> vector<128x64xf32>
    %c0_3 = arith.constant 0 : index
    %c0_4 = arith.constant 0 : index
    %4 = vector.load %arg3[%c0_3, %c0_4] : memref<1x64xf32, #tpu.memory_space<vmem>>, vector<1x64xf32>
    %5 = vector.broadcast %4 : vector<1x64xf32> to vector<128x64xf32>
    %6 = arith.addf %3, %5 : vector<128x64xf32>
    %7 = math.tanh %6 : vector<128x64xf32>
    %8 = arith.truncf %7 : vector<128x64xf32> to vector<128x64xbf16>
    %c0_5 = arith.constant 0 : index
    %c0_6 = arith.constant 0 : index
    %9 = vector.load %arg4[%c0_5, %c0_6] : memref<64x64xbf16, #tpu.memory_space<vmem>>, vector<64x64xbf16>
    %cst_7 = arith.constant dense<0.000000e+00> : vector<128x64xf32>
    %10 = tpu.matmul %8, %9, %cst_7 {dimension_numbers = #tpu.dot_dimension_numbers<[1], [0], [0], [1], [0, 0, 1, 1], [], []>} : vector<128x64xbf16>, vector<64x64xbf16>, vector<128x64xf32> -> vector<128x64xf32>
    %c0_8 = arith.constant 0 : index
    %c0_9 = arith.constant 0 : index
    %11 = vector.load %arg5[%c0_8, %c0_9] : memref<1x64xf32, #tpu.memory_space<vmem>>, vector<1x64xf32>
    %12 = vector.broadcast %11 : vector<1x64xf32> to vector<128x64xf32>
    %13 = arith.addf %10, %12 : vector<128x64xf32>
    %14 = math.tanh %13 : vector<128x64xf32>
    %15 = arith.truncf %14 : vector<128x64xf32> to vector<128x64xbf16>
    %c0_10 = arith.constant 0 : index
    %c0_11 = arith.constant 0 : index
    %16 = vector.load %arg6[%c0_10, %c0_11] : memref<64x8xbf16, #tpu.memory_space<vmem>>, vector<64x8xbf16>
    %cst_12 = arith.constant dense<0.000000e+00> : vector<128x8xf32>
    %17 = tpu.matmul %15, %16, %cst_12 {dimension_numbers = #tpu.dot_dimension_numbers<[1], [0], [0], [1], [0, 0, 1, 1], [], []>} : vector<128x64xbf16>, vector<64x8xbf16>, vector<128x8xf32> -> vector<128x8xf32>
    %c0_13 = arith.constant 0 : index
    %c0_14 = arith.constant 0 : index
    %18 = vector.load %arg7[%c0_13, %c0_14] : memref<1x8xf32, #tpu.memory_space<vmem>>, vector<1x8xf32>
    %19 = vector.broadcast %18 : vector<1x8xf32> to vector<128x8xf32>
    %20 = arith.addf %17, %19 : vector<128x8xf32>
    %21 = tpu.iota {dimensions = array<i32: 1>} : vector<128x8xi32>
    %c0_15 = arith.constant 0 : index
    %c0_16 = arith.constant 0 : index
    %22 = vector.load %arg8[%c0_15, %c0_16] : memref<1x8xf32, #tpu.memory_space<vmem>>, vector<1x8xf32>
    %23 = math.tanh %20 : vector<128x8xf32>
    %24 = vector.broadcast %22 : vector<1x8xf32> to vector<128x8xf32>
    %25 = arith.mulf %24, %23 : vector<128x8xf32>
    %cst_17 = arith.constant 0.000000e+00 : f32
    %26 = vector.broadcast %cst_17 : f32 to vector<128x8xf32>
    %27 = arith.maximumf %20, %26 : vector<128x8xf32>
    %28 = math.absf %20 : vector<128x8xf32>
    %cst_18 = arith.constant 0.000000e+00 : f32
    %29 = vector.broadcast %cst_18 : f32 to vector<128x8xf32>
    %30 = arith.subf %29, %28 : vector<128x8xf32>
    %31 = math.exp %30 : vector<128x8xf32>
    %32 = math.log1p %31 : vector<128x8xf32>
    %33 = arith.addf %27, %32 : vector<128x8xf32>
    %cst_19 = arith.constant 1.000000e+01 : f32
    %34 = vector.broadcast %cst_19 : f32 to vector<128x8xf32>
    %35 = arith.mulf %34, %33 : vector<128x8xf32>
    %cst_20 = arith.constant 9.99999996E-13 : f32
    %36 = vector.broadcast %cst_20 : f32 to vector<128x8xf32>
    %37 = arith.addf %35, %36 : vector<128x8xf32>
    %c4_i32 = arith.constant 4 : i32
    %38 = vector.broadcast %c4_i32 : i32 to vector<128x8xi32>
    %39 = arith.cmpi slt, %21, %38 : vector<128x8xi32>
    %40 = arith.select %39, %25, %37 : vector<128x8xi1>, vector<128x8xf32>
    %41 = vector.shape_cast %40 : vector<128x8xf32> to vector<8x128xf32>
    %c0_21 = arith.constant 0 : index
    %c0_22 = arith.constant 0 : index
    %42 = vector.load %arg9[%c0_21, %c0_22] : memref<8x128xf32, #tpu.memory_space<vmem>>, vector<8x128xf32>
    tpu.vector_store %arg9[%c0_21, %c0_22], %41 {strides = array<i32>} : memref<8x128xf32, #tpu.memory_space<vmem>>, vector<8x128xf32>,
    return
  }
  func.func @transform_0(%arg0: i32) -> (i32, i32) {
    %c0_i32 = arith.constant 0 : i32
    %c0_i32_0 = arith.constant 0 : i32
    return %arg0, %c0_i32 : i32, i32
  }
  func.func @transform_1(%arg0: i32) -> (i32, i32) {
    %c0_i32 = arith.constant 0 : i32
    %c0_i32_0 = arith.constant 0 : i32
    %c0_i32_1 = arith.constant 0 : i32
    return %c0_i32, %c0_i32_0 : i32, i32
  }
  func.func @transform_2(%arg0: i32) -> (i32, i32) {
    %c0_i32 = arith.constant 0 : i32
    %c0_i32_0 = arith.constant 0 : i32
    %c0_i32_1 = arith.constant 0 : i32
    return %c0_i32, %c0_i32_0 : i32, i32
  }
  func.func @transform_3(%arg0: i32) -> (i32, i32) {
    %c0_i32 = arith.constant 0 : i32
    %c0_i32_0 = arith.constant 0 : i32
    %c0_i32_1 = arith.constant 0 : i32
    return %c0_i32, %c0_i32_0 : i32, i32
  }
  func.func @transform_4(%arg0: i32) -> (i32, i32) {
    %c0_i32 = arith.constant 0 : i32
    %c0_i32_0 = arith.constant 0 : i32
    %c0_i32_1 = arith.constant 0 : i32
    return %c0_i32, %c0_i32_0 : i32, i32
  }
  func.func @transform_5(%arg0: i32) -> (i32, i32) {
    %c0_i32 = arith.constant 0 : i32
    %c0_i32_0 = arith.constant 0 : i32
    %c0_i32_1 = arith.constant 0 : i32
    return %c0_i32, %c0_i32_0 : i32, i32
  }
  func.func @transform_6(%arg0: i32) -> (i32, i32) {
    %c0_i32 = arith.constant 0 : i32
    %c0_i32_0 = arith.constant 0 : i32
    %c0_i32_1 = arith.constant 0 : i32
    return %c0_i32, %c0_i32_0 : i32, i32
  }
  func.func @transform_7(%arg0: i32) -> (i32, i32) {
    %c0_i32 = arith.constant 0 : i32
    %c0_i32_0 = arith.constant 0 : i32
    %c0_i32_1 = arith.constant 0 : i32
    return %c0_i32, %c0_i32_0 : i32, i32
  }
  func.func @transform_8(%arg0: i32) -> (i32, i32) {
    %c0_i32 = arith.constant 0 : i32
    %c0_i32_0 = arith.constant 0 : i32
    return %arg0, %c0_i32 : i32, i32
  }
}

module attributes {stable_mosaic.version = 11 : i64} {
  func.func @policy_kernel(%arg0: i32, %arg1: memref<128x16xf32, #tpu.memory_space<vmem>>, %arg2: memref<16x64xbf16, #tpu.memory_space<vmem>>, %arg3: memref<1x64xf32, #tpu.memory_space<vmem>>, %arg4: memref<64x64xbf16, #tpu.memory_space<vmem>>, %arg5: memref<1x64xf32, #tpu.memory_space<vmem>>, %arg6: memref<64x8xbf16, #tpu.memory_space<vmem>>, %arg7: memref<1x8xf32, #tpu.memory_space<vmem>>, %arg8: memref<1x8xf32, #tpu.memory_space<vmem>>, %arg9: memref<128x8xf32, #tpu.memory_space<vmem>>) attributes {dimension_semantics = [#tpu.dimension_semantics<parallel>], iteration_bounds = array<i64: 2>, scalar_prefetch = 0 : i64, scratch_operands = 0 : i64, tpu.core_type = #tpu.core_type<tc>, window_params = [{transform_indices = @transform_0, window_bounds = array<i64: 128, 16>}, {pipeline_mode = #tpu.pipeline_mode<synchronous>, transform_indices = @transform_1, window_bounds = array<i64: 16, 64>}, {pipeline_mode = #tpu.pipeline_mode<synchronous>, transform_indices = @transform_2, window_bounds = array<i64: 1, 64>}, {pipeline_mode = #tpu.pipeline_mode<synchronous>, transform_indices = @transform_3, window_bounds = array<i64: 64, 64>}, {pipeline_mode = #tpu.pipeline_mode<synchronous>, transform_indices = @transform_4, window_bounds = array<i64: 1, 64>}, {pipeline_mode = #tpu.pipeline_mode<synchronous>, transform_indices = @transform_5, window_bounds = array<i64: 64, 8>}, {pipeline_mode = #tpu.pipeline_mode<synchronous>, transform_indices = @transform_6, window_bounds = array<i64: 1, 8>}, {pipeline_mode = #tpu.pipeline_mode<synchronous>, transform_indices = @transform_7, window_bounds = array<i64: 1, 8>}, {transform_indices = @transform_8, window_bounds = array<i64: 128, 8>}]} {
    %c0 = arith.constant 0 : index
    %c0_0 = arith.constant 0 : index
    %0 = vector.load %arg1[%c0, %c0_0] : memref<128x16xf32, #tpu.memory_space<vmem>>, vector<128x16xf32>
    %1 = arith.truncf %0 : vector<128x16xf32> to vector<128x16xbf16>
    %c0_1 = arith.constant 0 : index
    %c0_2 = arith.constant 0 : index
    %2 = vector.load %arg2[%c0_1, %c0_2] : memref<16x64xbf16, #tpu.memory_space<vmem>>, vector<16x64xbf16>
    %cst = arith.constant dense<0.000000e+00> : vector<128x64xf32>
    %3 = tpu.matmul %1, %2, %cst {dimension_numbers = #tpu.dot_dimension_numbers<[1], [0], [0], [1], [0, 0, 1, 1], [], []>} : vector<128x16xbf16>, vector<16x64xbf16>, vector<128x64xf32> -> vector<128x64xf32>
    %c0_3 = arith.constant 0 : index
    %c0_4 = arith.constant 0 : index
    %4 = vector.load %arg3[%c0_3, %c0_4] : memref<1x64xf32, #tpu.memory_space<vmem>>, vector<1x64xf32>
    %5 = vector.broadcast %4 : vector<1x64xf32> to vector<128x64xf32>
    %6 = arith.addf %3, %5 : vector<128x64xf32>
    %7 = math.tanh %6 : vector<128x64xf32>
    %8 = arith.truncf %7 : vector<128x64xf32> to vector<128x64xbf16>
    %c0_5 = arith.constant 0 : index
    %c0_6 = arith.constant 0 : index
    %9 = vector.load %arg4[%c0_5, %c0_6] : memref<64x64xbf16, #tpu.memory_space<vmem>>, vector<64x64xbf16>
    %cst_7 = arith.constant dense<0.000000e+00> : vector<128x64xf32>
    %10 = tpu.matmul %8, %9, %cst_7 {dimension_numbers = #tpu.dot_dimension_numbers<[1], [0], [0], [1], [0, 0, 1, 1], [], []>} : vector<128x64xbf16>, vector<64x64xbf16>, vector<128x64xf32> -> vector<128x64xf32>
    %c0_8 = arith.constant 0 : index
    %c0_9 = arith.constant 0 : index
    %11 = vector.load %arg5[%c0_8, %c0_9] : memref<1x64xf32, #tpu.memory_space<vmem>>, vector<1x64xf32>
    %12 = vector.broadcast %11 : vector<1x64xf32> to vector<128x64xf32>
    %13 = arith.addf %10, %12 : vector<128x64xf32>
    %14 = math.tanh %13 : vector<128x64xf32>
    %15 = arith.truncf %14 : vector<128x64xf32> to vector<128x64xbf16>
    %c0_10 = arith.constant 0 : index
    %c0_11 = arith.constant 0 : index
    %16 = vector.load %arg6[%c0_10, %c0_11] : memref<64x8xbf16, #tpu.memory_space<vmem>>, vector<64x8xbf16>
    %cst_12 = arith.constant dense<0.000000e+00> : vector<128x8xf32>
    %17 = tpu.matmul %15, %16, %cst_12 {dimension_numbers = #tpu.dot_dimension_numbers<[1], [0], [0], [1], [0, 0, 1, 1], [], []>} : vector<128x64xbf16>, vector<64x8xbf16>, vector<128x8xf32> -> vector<128x8xf32>
    %c0_13 = arith.constant 0 : index
    %c0_14 = arith.constant 0 : index
    %18 = vector.load %arg7[%c0_13, %c0_14] : memref<1x8xf32, #tpu.memory_space<vmem>>, vector<1x8xf32>
    %19 = vector.broadcast %18 : vector<1x8xf32> to vector<128x8xf32>
    %20 = arith.addf %17, %19 : vector<128x8xf32>
    %21 = tpu.iota {dimensions = array<i32: 1>} : vector<128x8xi32>
    %c0_15 = arith.constant 0 : index
    %c0_16 = arith.constant 0 : index
    %22 = vector.load %arg8[%c0_15, %c0_16] : memref<1x8xf32, #tpu.memory_space<vmem>>, vector<1x8xf32>
    %23 = math.tanh %20 : vector<128x8xf32>
    %24 = vector.broadcast %22 : vector<1x8xf32> to vector<128x8xf32>
    %25 = arith.mulf %24, %23 : vector<128x8xf32>
    %cst_17 = arith.constant 0.000000e+00 : f32
    %26 = vector.broadcast %cst_17 : f32 to vector<128x8xf32>
    %27 = arith.maximumf %20, %26 : vector<128x8xf32>
    %28 = math.absf %20 : vector<128x8xf32>
    %cst_18 = arith.constant 0.000000e+00 : f32
    %29 = vector.broadcast %cst_18 : f32 to vector<128x8xf32>
    %30 = arith.subf %29, %28 : vector<128x8xf32>
    %31 = math.exp %30 : vector<128x8xf32>
    %32 = math.log1p %31 : vector<128x8xf32>
    %33 = arith.addf %27, %32 : vector<128x8xf32>
    %cst_19 = arith.constant 1.000000e+01 : f32
    %34 = vector.broadcast %cst_19 : f32 to vector<128x8xf32>
    %35 = arith.mulf %34, %33 : vector<128x8xf32>
    %cst_20 = arith.constant 9.99999996E-13 : f32
    %36 = vector.broadcast %cst_20 : f32 to vector<128x8xf32>
    %37 = arith.addf %35, %36 : vector<128x8xf32>
    %c4_i32 = arith.constant 4 : i32
    %38 = vector.broadcast %c4_i32 : i32 to vector<128x8xi32>
    %39 = arith.cmpi slt, %21, %38 : vector<128x8xi32>
    %40 = arith.select %39, %25, %37 : vector<128x8xi1>, vector<128x8xf32>
    %c0_21 = arith.constant 0 : index
    %c0_22 = arith.constant 0 : index
    %41 = vector.load %arg9[%c0_21, %c0_22] : memref<128x8xf32, #tpu.memory_space<vmem>>, vector<128x8xf32>
    tpu.vector_store %arg9[%c0_21, %c0_22], %40 {strides = array<i32>} : memref<128x8xf32, #tpu.memory_space<vmem>>, vector<128x8xf32>,
    return
  }
  func.func @transform_0(%arg0: i32) -> (i32, i32) {
    %c0_i32 = arith.constant 0 : i32
    %c0_i32_0 = arith.constant 0 : i32
    return %arg0, %c0_i32 : i32, i32
  }
  func.func @transform_1(%arg0: i32) -> (i32, i32) {
    %c0_i32 = arith.constant 0 : i32
    %c0_i32_0 = arith.constant 0 : i32
    %c0_i32_1 = arith.constant 0 : i32
    return %c0_i32, %c0_i32_0 : i32, i32
  }
  func.func @transform_2(%arg0: i32) -> (i32, i32) {
    %c0_i32 = arith.constant 0 : i32
    %c0_i32_0 = arith.constant 0 : i32
    %c0_i32_1 = arith.constant 0 : i32
    return %c0_i32, %c0_i32_0 : i32, i32
  }
  func.func @transform_3(%arg0: i32) -> (i32, i32) {
    %c0_i32 = arith.constant 0 : i32
    %c0_i32_0 = arith.constant 0 : i32
    %c0_i32_1 = arith.constant 0 : i32
    return %c0_i32, %c0_i32_0 : i32, i32
  }
  func.func @transform_4(%arg0: i32) -> (i32, i32) {
    %c0_i32 = arith.constant 0 : i32
    %c0_i32_0 = arith.constant 0 : i32
    %c0_i32_1 = arith.constant 0 : i32
    return %c0_i32, %c0_i32_0 : i32, i32
  }
  func.func @transform_5(%arg0: i32) -> (i32, i32) {
    %c0_i32 = arith.constant 0 : i32
    %c0_i32_0 = arith.constant 0 : i32
    %c0_i32_1 = arith.constant 0 : i32
    return %c0_i32, %c0_i32_0 : i32, i32
  }
  func.func @transform_6(%arg0: i32) -> (i32, i32) {
    %c0_i32 = arith.constant 0 : i32
    %c0_i32_0 = arith.constant 0 : i32
    %c0_i32_1 = arith.constant 0 : i32
    return %c0_i32, %c0_i32_0 : i32, i32
  }
  func.func @transform_7(%arg0: i32) -> (i32, i32) {
    %c0_i32 = arith.constant 0 : i32
    %c0_i32_0 = arith.constant 0 : i32
    %c0_i32_1 = arith.constant 0 : i32
    return %c0_i32, %c0_i32_0 : i32, i32
  }
  func.func @transform_8(%arg0: i32) -> (i32, i32) {
    %c0_i32 = arith.constant 0 : i32
    %c0_i32_0 = arith.constant 0 : i32
    return %arg0, %c0_i32 : i32, i32
  }
}

</mosaic_0001>

<bundles_post_ra>
// kernel: tpu_custom_call.1
= control target key start
LH: loop header
LB: loop body
LE: loop exit
PB: predicated region body
PF: predicated region fallthrough
CT: control target
= control target key end

     0   :  { %s1401_s27 = smov 0   ;;  %s1722_s0 = inlined_call_operand.vmem [shape: f32[256,16], index: 0, kind: input, shape index: {}]   ;;  %s1723_s1 = inlined_call_operand.vmem [shape: bf16[16,64], index: 1, kind: input, shape index: {}]   ;;  %s1724_s2 = inlined_call_operand.vmem [shape: f32[1,64], index: 2, kind: input, shape index: {}]   ;;  %s1725_s3 = inlined_call_operand.vmem [shape: bf16[64,64], index: 3, kind: input, shape index: {}]   ;;  %s1726_s4 = inlined_call_operand.vmem [shape: f32[1,64], index: 4, kind: input, shape index: {}]   ;;  %s1727_s5 = inlined_call_operand.vmem [shape: bf16[64,8], index: 5, kind: input, shape index: {}]   ;;  %s1728_s6 = inlined_call_operand.vmem [shape: f32[1,8], index: 6, kind: input, shape index: {}]   ;;  %s1729_s7 = inlined_call_operand.vmem [shape: f32[1,8], index: 7, kind: input, shape index: {}]   ;;  %s1730_s8 = inlined_call_operand.vmem [shape: f32[256,8], index: 8, kind: output, shape index: {}]  }
   0x1 LB: > { %s1087_s28 = sadd.s32 4294967295, %s1354_s27   ;;  %p1091_p0 = scmp.ge.s32.totalorder %s1354_s27, 1  ;;  %s1354_s27 = sphi %s1401_s27, %s18_s27  }
   0x2   : > { %p263_p1 = scmp.lt.s32.totalorder %s1354_s27, 3 }
   0x4   : > { %p264_p2 = pnand %p1091_p0, %p263_p1 }
   0x5   : > { %s1092_s9 = sshll.u32 (!%p264_p2), %s1087_s28, 4 }
   0x6   : > { %267 = sbr.rel (%p264_p2) target bundleno = 600 (0x258), region = 52  ;;  %p298_p3 = scmp.lt.s32.totalorder (!%p264_p2), %s1092_s9, 31 }
   0xb   : > { %v1158_v0 = vld [vmem:[%s1723_s1] sm:$0xff]  ;;  %s1732_s9 = smov (!%p298_p3, %s1092_s9), 31  ;;  %vm346_vm0 = vcmask 130048   ;;  %v1162_v25 = vld [vmem:[%s1725_s3 + $0x18] sm:$0xff]  ;;  %v1161_v26 = vld [vmem:[%s1725_s3 + $0x10] sm:$0xff]  ;;  %vm480_vm1 = vcmask 523264  }
   0xc   : > { %378 = vmatpush.bf16.msra.mxu0 %v1158_v0  ;;  %1167 = vmatpush.bf16.msra.mxu3 %v1158_v0  ;;  %s1093_s10 = sshll.u32 %s1732_s9, 3  ;;  %v1160_v27 = vld [vmem:[%s1725_s3 + $0x8] sm:$0xff]  ;;  %v1159_v28 = vld [vmem:[%s1725_s3] sm:$0xff]  ;;  %vm1014_vm4 = vcmask 64512  }
   0xd   : > { %s1420_s13 = scalar_lea.vmem %s1722_s0, %s1093_s10  ;;  %509 = vmatpush.bf16.msra.mxu1 %v1162_v25  ;;  %v1461_v30 = vld [vmem:[%s1724_s2] ss:$0 sm:$0xff]  ;;  %s1560_s21 = scalar_lea.vmem %s1730_s8, %s1093_s10 }
   0xe   : > { %v310_v1 = vld [vmem:[%s1420_s13] sm:$0xff]  ;;  %v311_v2 = vld [vmem:[%s1420_s13 + $0x8] sm:$0xff]  ;;  %v312_v4 = vld [vmem:[%s1420_s13 + $0x10] sm:$0xff] }
   0xf   : > { %v326_v3 = vpack.c.bf16 %v311_v2, %v310_v1  ;;  %v313_v5 = vld [vmem:[%s1420_s13 + $0x18] sm:$0xff]  ;;  %v314_v7 = vld [vmem:[%s1420_s13 + $0x20] sm:$0xff]  ;;  %v315_v8 = vld [vmem:[%s1420_s13 + $0x28] sm:$0xff] }
  0x10   : > { %v327_v6 = vpack.c.bf16 %v313_v5, %v312_v4  ;;  %v328_v9 = vpack.c.bf16 %v315_v8, %v314_v7  ;;  %v316_v10 = vld [vmem:[%s1420_s13 + $0x30] sm:$0xff]  ;;  %v317_v11 = vld [vmem:[%s1420_s13 + $0x38] sm:$0xff]  ;;  %v318_v13 = vld [vmem:[%s1420_s13 + $0x40] sm:$0xff]  ;;  %1168 = vmatpush.bf16.msrb.mxu3 %v1162_v25 }
  0x11   : > { %1100 = vmatmul.msk.bf16.vlgmr.msra.gmra.mxu0 %vm346_vm0, %v326_v3  ;;  %v329_v12 = vpack.c.bf16 %v317_v11, %v316_v10  ;;  %v319_v14 = vld [vmem:[%s1420_s13 + $0x48] sm:$0xff]  ;;  %v324_v16 = vld [vmem:[%s1420_s13 + $0x70] sm:$0xff]  ;;  %v325_v17 = vld [vmem:[%s1420_s13 + $0x78] sm:$0xff]  ;;  %510 = vmatpush.bf16.msra.mxu1 %v1161_v26 }
  0x12   : > { %v330_v15 = vpack.c.bf16 %v319_v14, %v318_v13  ;;  %v333_v18 = vpack.c.bf16 %v325_v17, %v324_v16  ;;  %v320_v19 = vld [vmem:[%s1420_s13 + $0x50] sm:$0xff]  ;;  %v321_v20 = vld [vmem:[%s1420_s13 + $0x58] sm:$0xff]  ;;  %v322_v22 = vld [vmem:[%s1420_s13 + $0x60] sm:$0xff] }
  0x13   : > { %v331_v21 = vpack.c.bf16 %v321_v20, %v320_v19  ;;  %v323_v23 = vld [vmem:[%s1420_s13 + $0x68] sm:$0xff]  ;;  %v1165_v20 = vld [vmem:[%s1727_s5 + $0x10] sm:$0xff] }
  0x14   : > { %1107 = vmatmul.msk.bf16.vlgmr.msra.gmra.mxu3 %vm346_vm0, %v333_v18  ;;  %v332_v24 = vpack.c.bf16 %v323_v23, %v322_v22  ;;  %v1166_v18 = vld [vmem:[%s1727_s5 + $0x18] sm:$0xff] }
  0x15   : > { %1169 = vmatpush.bf16.msrb.mxu3 %v1161_v26  ;;  %511 = vmatpush.bf16.msra.mxu1 %v1160_v27 }
  0x16   : > { %642 = vmatpush.bf16.msra.mxu2 %v1166_v18 }
  0x19   : > { %1170 = vmatpush.bf16.msrb.mxu3 %v1160_v27  ;;  %512 = vmatpush.bf16.msra.mxu1 %v1159_v28  ;;  %v1502_v27 = vld [vmem:[%s1726_s4] ss:$0 sm:$0xff] }
  0x1a   : > { %643 = vmatpush.bf16.msra.mxu2 %v1165_v20 }
  0x1d   : > { %1171 = vmatpush.bf16.msrb.mxu3 %v1159_v28 }
  0x21   : > { %1101 = vmatmul.msk.bf16.gmra.mxu0 %vm346_vm0, %v327_v6  ;;  %1172 = vmatpush.bf16.msra.mxu3 %v1166_v18 }
  0x25   : > { %1173 = vmatpush.bf16.msra.mxu3 %v1165_v20 }
  0x31   : > { %1102 = vmatmul.msk.bf16.gmra.mxu0 %vm346_vm0, %v328_v9 }
  0x41   : > { %1103 = vmatmul.msk.bf16.gmra.mxu0 %vm346_vm0, %v329_v12 }
  0x51   : > { %1104 = vmatmul.msk.bf16.gmra.mxu0 %vm346_vm0, %v330_v15 }
  0x61   : > { %1105 = vmatmul.msk.bf16.gmra.mxu0 %vm346_vm0, %v331_v21  ;;  %v1164_v21 = vld [vmem:[%s1727_s5 + $0x8] sm:$0xff] }
  0x62   : > { %644 = vmatpush.bf16.msra.mxu2 %v1164_v21  ;;  %1174 = vmatpush.bf16.msra.mxu3 %v1164_v21 }
  0x71   : > { %1106 = vmatmul.msk.bf16.gmra.mxu0 %vm346_vm0, %v332_v24  ;;  %v1163_v24 = vld [vmem:[%s1727_s5] sm:$0xff] }
  0x72   : > { %645 = vmatpush.bf16.msra.mxu2 %v1163_v24  ;;  %1175 = vmatpush.bf16.msra.mxu3 %v1163_v24 }
  0x8e   : > { %v380_v29 = vpop.f32.mrf.mxu0 }
  0x8f   : > { %v381_v31 = vadd.f32 %v1461_v30, %v380_v29 }
  0x91   : > { %1188 = vtanh.f32 %v381_v31 }
  0x96   : > { %v382_v32 = vpop.f32.mrf.mxu0 }
  0x97   : > { %v383_v33 = vadd.f32 %v1461_v30, %v382_v32  ;;  %v1189_v34 = vpop.eup %1188  ;;  %v415_v11 = vpop.f32.mrf.mxu3 }
  0x98   : > { %v416_v17 = vadd.f32 %v1461_v30, %v415_v11 }
  0x99   : > { %1190 = vtanh.f32 %v383_v33 }
  0x9e   : > { %v385_v35 = vpop.f32.mrf.mxu0 }
  0x9f   : > { %v1191_v36 = vpop.eup %1190  ;;  %v386_v38 = vadd.f32 %v1461_v30, %v385_v35  ;;  %v417_v15 = vpop.f32.mrf.mxu3 }
  0xa0   : > { %v436_v37 = vpack.c.bf16 %v1191_v36, %v1189_v34  ;;  %v418_v19 = vadd.f32 %v1461_v30, %v417_v15 }
  0xa1   : > { %1192 = vtanh.f32 %v386_v38 }
  0xa2   : > { %1124 = vmatmul.msk.bf16.vlgmr.msra.gmra.mxu1 %vm480_vm1, %v436_v37 }
  0xa6   : > { %v387_v39 = vpop.f32.mrf.mxu0 }
  0xa7   : > { %v388_v40 = vadd.f32 %v1461_v30, %v387_v39  ;;  %v1193_v41 = vpop.eup %1192 }
  0xa9   : > { %1194 = vtanh.f32 %v388_v40 }
  0xae   : > { %v390_v42 = vpop.f32.mrf.mxu0 }
  0xaf   : > { %v1195_v43 = vpop.eup %1194  ;;  %v391_v45 = vadd.f32 %v1461_v30, %v390_v42 }
  0xb0   : > { %v437_v44 = vpack.c.bf16 %v1195_v43, %v1193_v41 }
  0xb1   : > { %1196 = vtanh.f32 %v391_v45 }
  0xb2   : > { %1125 = vmatmul.msk.bf16.gmra.mxu1 %vm480_vm1, %v437_v44 }
  0xb6   : > { %v392_v46 = vpop.f32.mrf.mxu0 }
  0xb7   : > { %v393_v47 = vadd.f32 %v1461_v30, %v392_v46  ;;  %v1197_v48 = vpop.eup %1196 }
  0xb9   : > { %1198 = vtanh.f32 %v393_v47 }
  0xbe   : > { %v395_v49 = vpop.f32.mrf.mxu0 }
  0xbf   : > { %v1199_v50 = vpop.eup %1198  ;;  %v396_v52 = vadd.f32 %v1461_v30, %v395_v49 }
  0xc0   : > { %v438_v51 = vpack.c.bf16 %v1199_v50, %v1197_v48 }
  0xc1   : > { %1200 = vtanh.f32 %v396_v52 }
  0xc2   : > { %1126 = vmatmul.msk.bf16.gmra.mxu1 %vm480_vm1, %v438_v51 }
  0xc6   : > { %v397_v53 = vpop.f32.mrf.mxu0 }
  0xc7   : > { %v398_v54 = vadd.f32 %v1461_v30, %v397_v53  ;;  %v1201_v55 = vpop.eup %1200 }
  0xc9   : > { %1202 = vtanh.f32 %v398_v54 }
  0xce   : > { %v400_v56 = vpop.f32.mrf.mxu0 }
  0xcf   : > { %v1203_v57 = vpop.eup %1202  ;;  %v401_v59 = vadd.f32 %v1461_v30, %v400_v56 }
  0xd0   : > { %v439_v58 = vpack.c.bf16 %v1203_v57, %v1201_v55 }
  0xd1   : > { %1204 = vtanh.f32 %v401_v59 }
  0xd2   : > { %1127 = vmatmul.msk.bf16.gmra.mxu1 %vm480_vm1, %v439_v58 }
  0xd6   : > { %v402_v60 = vpop.f32.mrf.mxu0 }
  0xd7   : > { %v403_v61 = vadd.f32 %v1461_v30, %v402_v60  ;;  %v1205_v62 = vpop.eup %1204 }
  0xd9   : > { %1206 = vtanh.f32 %v403_v61 }
  0xde   : > { %v405_v63 = vpop.f32.mrf.mxu0 }
  0xdf   : > { %v1207_v0 = vpop.eup %1206  ;;  %v406_v2 = vadd.f32 %v1461_v30, %v405_v63 }
  0xe0   : > { %v440_v1 = vpack.c.bf16 %v1207_v0, %v1205_v62 }
  0xe1   : > { %1208 = vtanh.f32 %v406_v2 }
  0xe2   : > { %1128 = vmatmul.msk.bf16.gmra.mxu1 %vm480_vm1, %v440_v1 }
  0xe6   : > { %v407_v3 = vpop.f32.mrf.mxu0 }
  0xe7   : > { %v408_v4 = vadd.f32 %v1461_v30, %v407_v3  ;;  %v1209_v5 = vpop.eup %1208 }
  0xe9   : > { %1210 = vtanh.f32 %v408_v4 }
  0xee   : > { %v410_v6 = vpop.f32.mrf.mxu0 }
  0xef   : > { %v1211_v7 = vpop.eup %1210  ;;  %v411_v9 = vadd.f32 %v1461_v30, %v410_v6 }
  0xf0   : > { %v441_v8 = vpack.c.bf16 %v1211_v7, %v1209_v5 }
  0xf1   : > { %1212 = vtanh.f32 %v411_v9 }
  0xf2   : > { %1129 = vmatmul.msk.bf16.gmra.mxu1 %vm480_vm1, %v441_v8 }
  0xf6   : > { %v412_v10 = vpop.f32.mrf.mxu0 }
  0xf7   : > { %v413_v12 = vadd.f32 %v1461_v30, %v412_v10  ;;  %v1213_v13 = vpop.eup %1212 }
  0xf9   : > { %1214 = vtanh.f32 %v413_v12 }
  0xfa   : > { %1216 = vtanh.f32 %v416_v17 }
  0xfb   : > { %1218 = vtanh.f32 %v418_v19  ;;  %v1531_v19 = vld [vmem:[%s1728_s6] ss:$0 sm:$0xff] }
  0xff   : > { %v1215_v14 = vpop.eup %1214 }
 0x100   : > { %v442_v16 = vpack.c.bf16 %v1215_v14, %v1213_v13  ;;  %v1217_v22 = vpop.eup %1216 }
 0x101   : > { %v1219_v23 = vpop.eup %1218 }
 0x102   : > { %1130 = vmatmul.msk.bf16.vlgmr.msrb.gmra.mxu3 %vm480_vm1, %v442_v16  ;;  %v443_v25 = vpack.c.bf16 %v1219_v23, %v1217_v22 }
 0x112   : > { %1131 = vmatmul.msk.bf16.gmra.mxu3 %vm480_vm1, %v443_v25 }
 0x11f   : > { %v514_v26 = vpop.f32.mrf.mxu1 }
 0x120   : > { %v515_v28 = vadd.f32 %v1502_v27, %v514_v26 }
 0x122   : > { %1220 = vtanh.f32 %v515_v28 }
 0x127   : > { %v516_v29 = vpop.f32.mrf.mxu1 }
 0x128   : > { %v517_v30 = vadd.f32 %v1502_v27, %v516_v29  ;;  %v1221_v31 = vpop.eup %1220 }
 0x12a   : > { %1222 = vtanh.f32 %v517_v30 }
 0x12f   : > { %v519_v32 = vpop.f32.mrf.mxu1 }
 0x130   : > { %v1223_v33 = vpop.eup %1222  ;;  %v520_v35 = vadd.f32 %v1502_v27, %v519_v32 }
 0x131   : > { %v570_v34 = vpack.c.bf16 %v1223_v33, %v1221_v31 }
 0x132   : > { %1224 = vtanh.f32 %v520_v35 }
 0x133   : > { %1148 = vmatmul.msk.bf16.vlgmr.msra.gmra.mxu2 %vm480_vm1, %v570_v34 }
 0x137   : > { %v521_v36 = vpop.f32.mrf.mxu1 }
 0x138   : > { %v522_v37 = vadd.f32 %v1502_v27, %v521_v36  ;;  %v1225_v38 = vpop.eup %1224 }
 0x13a   : > { %1226 = vtanh.f32 %v522_v37 }
 0x13f   : > { %v524_v39 = vpop.f32.mrf.mxu1 }
 0x140   : > { %v1227_v40 = vpop.eup %1226  ;;  %v525_v42 = vadd.f32 %v1502_v27, %v524_v39 }
 0x141   : > { %v571_v41 = vpack.c.bf16 %v1227_v40, %v1225_v38  ;;  %v687_v40 = vlaneseq }
 0x142   : > { %1228 = vtanh.f32 %v525_v42 }
 0x143   : > { %1149 = vmatmul.msk.bf16.gmra.mxu2 %vm480_vm1, %v571_v41 }
 0x147   : > { %v526_v43 = vpop.f32.mrf.mxu1 }
 0x148   : > { %v527_v44 = vadd.f32 %v1502_v27, %v526_v43  ;;  %v1229_v45 = vpop.eup %1228 }
 0x14a   : > { %1230 = vtanh.f32 %v527_v44 }
 0x14f   : > { %v529_v46 = vpop.f32.mrf.mxu1 }
 0x150   : > { %v1231_v47 = vpop.eup %1230  ;;  %v530_v49 = vadd.f32 %v1502_v27, %v529_v46 }
 0x151   : > { %v572_v48 = vpack.c.bf16 %v1231_v47, %v1229_v45 }
 0x152   : > { %1232 = vtanh.f32 %v530_v49 }
 0x153   : > { %1150 = vmatmul.msk.bf16.gmra.mxu2 %vm480_vm1, %v572_v48 }
 0x157   : > { %v531_v50 = vpop.f32.mrf.mxu1 }
 0x158   : > { %v532_v51 = vadd.f32 %v1502_v27, %v531_v50  ;;  %v1233_v52 = vpop.eup %1232  ;;  %v1545_v50 = vand.u32 127, %v687_v40 }
 0x15a   : > { %1234 = vtanh.f32 %v532_v51  ;;  %vm997_vm3 = vcmp.lt.s32.totalorder %v1545_v50, 4 }
 0x15f   : > { %v534_v53 = vpop.f32.mrf.mxu1 }
 0x160   : > { %v1235_v54 = vpop.eup %1234  ;;  %v535_v56 = vadd.f32 %v1502_v27, %v534_v53  ;;  %v1551_v53 = vld [vmem:[%s1729_s7] ss:$0 sm:$0xff] }
 0x161   : > { %v573_v55 = vpack.c.bf16 %v1235_v54, %v1233_v52 }
 0x162   : > { %1236 = vtanh.f32 %v535_v56 }
 0x163   : > { %1151 = vmatmul.msk.bf16.gmra.mxu2 %vm480_vm1, %v573_v55 }
 0x167   : > { %v536_v57 = vpop.f32.mrf.mxu1 }
 0x168   : > { %v537_v58 = vadd.f32 %v1502_v27, %v536_v57  ;;  %v1237_v59 = vpop.eup %1236 }
 0x16a   : > { %1238 = vtanh.f32 %v537_v58 }
 0x16f   : > { %v539_v60 = vpop.f32.mrf.mxu1 }
 0x170   : > { %v1239_v61 = vpop.eup %1238  ;;  %v540_v63 = vadd.f32 %v1502_v27, %v539_v60 }
 0x171   : > { %v574_v62 = vpack.c.bf16 %v1239_v61, %v1237_v59 }
 0x172   : > { %1240 = vtanh.f32 %v540_v63 }
 0x173   : > { %1152 = vmatmul.msk.bf16.gmra.mxu2 %vm480_vm1, %v574_v62 }
 0x177   : > { %v541_v0 = vpop.f32.mrf.mxu1 }
 0x178   : > { %v542_v1 = vadd.f32 %v1502_v27, %v541_v0  ;;  %v1241_v2 = vpop.eup %1240 }
 0x17a   : > { %1242 = vtanh.f32 %v542_v1 }
 0x180   : > { %v1243_v3 = vpop.eup %1242 }
 0x181   : > { %v575_v4 = vpack.c.bf16 %v1243_v3, %v1241_v2 }
 0x183   : > { %1153 = vmatmul.msk.bf16.gmra.mxu2 %vm480_vm1, %v575_v4 }
 0x185   : > { %v544_v5 = vpop.f32.mrf.mxu3 }
 0x186   : > { %v545_v6 = vadd.f32 %v1502_v27, %v544_v5 }
 0x188   : > { %1244 = vtanh.f32 %v545_v6 }
 0x18d   : > { %v546_v7 = vpop.f32.mrf.mxu3 }
 0x18e   : > { %v547_v8 = vadd.f32 %v1502_v27, %v546_v7  ;;  %v1245_v9 = vpop.eup %1244 }
 0x190   : > { %1246 = vtanh.f32 %v547_v8 }
 0x195   : > { %v549_v10 = vpop.f32.mrf.mxu3 }
 0x196   : > { %v1247_v11 = vpop.eup %1246  ;;  %v550_v13 = vadd.f32 %v1502_v27, %v549_v10 }
 0x197   : > { %v576_v12 = vpack.c.bf16 %v1247_v11, %v1245_v9 }
 0x198   : > { %1248 = vtanh.f32 %v550_v13 }
 0x199   : > { %1154 = vmatmul.msk.bf16.vlgmr.msra.gmra.mxu3 %vm480_vm1, %v576_v12 }
 0x19d   : > { %v551_v14 = vpop.f32.mrf.mxu3 }
 0x19e   : > { %v552_v15 = vadd.f32 %v1502_v27, %v551_v14  ;;  %v1249_v16 = vpop.eup %1248 }
 0x1a0   : > { %1250 = vtanh.f32 %v552_v15 }
 0x1a6   : > { %v1251_v17 = vpop.eup %1250 }
 0x1a7   : > { %v577_v18 = vpack.c.bf16 %v1251_v17, %v1249_v16 }
 0x1a9   : > { %1155 = vmatmul.msk.bf16.gmra.mxu3 %vm480_vm1, %v577_v18 }
 0x1b6   : > { %v647_v20 = vpop.f32.mrf.mxu2 }
 0x1b7   : > { %v648_v21 = vadd.f32 %v1531_v19, %v647_v20 }
 0x1b9   : > { %v741_v22 = vand.u32 2147483647, %v648_v21  ;;  %v725_v49 = vmax.f32 %v648_v21, 0.0 }
 0x1bb   : > { %v757_v23 = vsub.f32 0.0, %v741_v22 }
 0x1bd   : > { %v773_v24 = vmul.f32 1.442695, %v757_v23 }
 0x1be   : > { %v649_v25 = vpop.f32.mrf.mxu2 }
 0x1bf   : > { %1252 = vpow2.f32 %v773_v24  ;;  %v1535_v26 = vadd.f32 %v1531_v19, %v649_v25 }
 0x1c1   : > { %v742_v27 = vand.u32 2147483647, %v1535_v26  ;;  %v726_v8 = vmax.f32 %v1535_v26, 0.0 }
 0x1c3   : > { %v758_v28 = vsub.f32 0.0, %v742_v27 }
 0x1c5   : > { %v1253_v29 = vpop.eup %1252  ;;  %v775_v30 = vmul.f32 1.442695, %v758_v28 }
 0x1c6   : > { %v805_v31 = vadd.f32 1.0, %v1253_v29  ;;  %v808_v32 = vmul.f32 -0.5, %v1253_v29  ;;  %v652_v33 = vpop.f32.mrf.mxu2  ;;  %v811_v38 = vand.u32 2147483647, %v1253_v29 }
 0x1c7   : > { %1254 = vpow2.f32 %v775_v30  ;;  %v1539_v34 = vadd.f32 %v1531_v19, %v652_v33 }
 0x1c8   : > { %1256 = vlog2.f32 %v805_v31  ;;  %v809_v36 = vadd.f32 1.0, %v808_v32  ;;  %vm812_vm2 = vcmp.lt.f32.partialorder %v811_v38, 0.0004427343 }
 0x1c9   : > { %v743_v35 = vand.u32 2147483647, %v1539_v34  ;;  %1258 = vtanh.f32 %v648_v21  ;;  %v727_v30 = vmax.f32 %v1539_v34, 0.0 }
 0x1ca   : > { %v810_v43 = vmul.f32 %v1253_v29, %v809_v36 }
 0x1cb   : > { %v759_v37 = vsub.f32 0.0, %v743_v35 }
 0x1cd   : > { %v1255_v39 = vpop.eup %1254  ;;  %v777_v41 = vmul.f32 1.442695, %v759_v37 }
 0x1ce   : > { %v1257_v42 = vpop.eup %1256  ;;  %v814_v44 = vadd.f32 1.0, %v1255_v39  ;;  %v654_v45 = vpop.f32.mrf.mxu2  ;;  %v817_v47 = vmul.f32 -0.5, %v1255_v39  ;;  %v820_v59 = vand.u32 2147483647, %v1255_v39 }
 0x1cf   : > { %v807_v46 = vmul.f32 0.6931472, %v1257_v42  ;;  %1260 = vpow2.f32 %v777_v41  ;;  %v1543_v48 = vadd.f32 %v1531_v19, %v654_v45  ;;  %v1259_v55 = vpop.eup %1258 }
 0x1d0   : > { %1262 = vlog2.f32 %v814_v44  ;;  %v818_v56 = vadd.f32 1.0, %v817_v47  ;;  %v709_v63 = vmul.f32 %v1259_v55, %v1551_v53  ;;  %vm821_vm5 = vcmp.lt.f32.partialorder %v820_v59, 0.0004427343 }
 0x1d1   : > { %v813_v51 = vsel %vm812_vm2, %v810_v43, %v807_v46  ;;  %v744_v52 = vand.u32 2147483647, %v1543_v48  ;;  %1264 = vtanh.f32 %v1535_v26  ;;  %v728_v45 = vmax.f32 %v1543_v48, 0.0 }
 0x1d2   : > { %v949_v54 = vadd.f32 %v813_v51, %v725_v49  ;;  %v819_v5 = vmul.f32 %v1255_v39, %v818_v56 }
 0x1d3   : > { %v760_v57 = vsub.f32 0.0, %v744_v52 }
 0x1d4   : > { %v965_v58 = vmul.f32 10.0, %v949_v54 }
 0x1d5   : > { %v1261_v60 = vpop.eup %1260  ;;  %v779_v61 = vmul.f32 1.442695, %v760_v57 }
 0x1d6   : > { %v1263_v62 = vpop.eup %1262  ;;  %v981_v0 = vadd.f32 1e-12, %v965_v58  ;;  %v823_v1 = vadd.f32 1.0, %v1261_v60  ;;  %v826_v2 = vmul.f32 -0.5, %v1261_v60  ;;  %v657_v3 = vpop.f32.mrf.mxu2  ;;  %v829_v15 = vand.u32 2147483647, %v1261_v60 }
 0x1d7   : > { %v816_v4 = vmul.f32 0.6931472, %v1263_v62  ;;  %1266 = vpow2.f32 %v779_v61  ;;  %v1564_v6 = vadd.f32 %v1531_v19, %v657_v3  ;;  %v1265_v13 = vpop.eup %1264 }
 0x1d8   : > { %v998_v7 = vsel %vm997_vm3, %v709_v63, %v981_v0  ;;  %1268 = vlog2.f32 %v823_v1  ;;  %v827_v11 = vadd.f32 1.0, %v826_v2  ;;  %v710_v20 = vmul.f32 %v1265_v13, %v1551_v53 }
 0x1d9   : > { %1015 = vst.msk [vmem:[%s1560_s21] sm:$0xff] %vm1014_vm4, %v998_v7  ;;  %v822_v9 = vsel %vm821_vm5, %v819_v5, %v816_v4  ;;  %v745_v12 = vand.u32 2147483647, %v1564_v6  ;;  %1270 = vtanh.f32 %v1539_v34  ;;  %vm830_vm6 = vcmp.lt.f32.partialorder %v829_v15, 0.0004427343 }
 0x1da   : > { %v950_v10 = vadd.f32 %v822_v9, %v726_v8  ;;  %v828_v22 = vmul.f32 %v1261_v60, %v827_v11 }
 0x1db   : > { %v761_v16 = vsub.f32 0.0, %v745_v12  ;;  %v729_v12 = vmax.f32 %v1564_v6, 0.0 }
 0x1dc   : > { %v966_v14 = vmul.f32 10.0, %v950_v10 }
 0x1dd   : > { %v1267_v17 = vpop.eup %1266  ;;  %v781_v27 = vmul.f32 1.442695, %v761_v16 }
 0x1de   : > { %v1269_v18 = vpop.eup %1268  ;;  %v982_v21 = vadd.f32 1e-12, %v966_v14  ;;  %v832_v23 = vadd.f32 1.0, %v1267_v17  ;;  %v659_v24 = vpop.f32.mrf.mxu2  ;;  %v835_v26 = vmul.f32 -0.5, %v1267_v17  ;;  %v838_v38 = vand.u32 2147483647, %v1267_v17 }
 0x1df   : > { %v825_v25 = vmul.f32 0.6931472, %v1269_v18  ;;  %v1575_v28 = vadd.f32 %v1531_v19, %v659_v24  ;;  %v1271_v35 = vpop.eup %1270 }
 0x1e0   : > { %v999_v29 = vsel %vm997_vm3, %v710_v20, %v982_v21  ;;  %1272 = vlog2.f32 %v832_v23  ;;  %v836_v36 = vadd.f32 1.0, %v835_v26  ;;  %v711_v34 = vmul.f32 %v1271_v35, %v1551_v53 }
 0x1e1   : > { %1016 = vst.msk [vmem:[%s1560_s21 + $0x8] sm:$0xff] %vm1014_vm4, %v999_v29  ;;  %v831_v31 = vsel %vm830_vm6, %v828_v22, %v825_v25  ;;  %1274 = vpow2.f32 %v781_v27  ;;  %v746_v33 = vand.u32 2147483647, %v1575_v28  ;;  %vm839_vm7 = vcmp.lt.f32.partialorder %v838_v38, 0.0004427343 }
 0x1e2   : > { %v951_v32 = vadd.f32 %v831_v31, %v727_v30  ;;  %1276 = vtanh.f32 %v1543_v48  ;;  %v837_v47 = vmul.f32 %v1267_v17, %v836_v36  ;;  %v730_v35 = vmax.f32 %v1575_v28, 0.0 }
 0x1e3   : > { %v762_v39 = vsub.f32 0.0, %v746_v33 }
 0x1e4   : > { %v967_v37 = vmul.f32 10.0, %v951_v32 }
 0x1e5   : > { %v783_v42 = vmul.f32 1.442695, %v762_v39 }
 0x1e6   : > { %v1273_v40 = vpop.eup %1272  ;;  %v983_v41 = vadd.f32 1e-12, %v967_v37  ;;  %v662_v43 = vpop.f32.mrf.mxu2 }
 0x1e7   : > { %v1275_v44 = vpop.eup %1274  ;;  %v834_v46 = vmul.f32 0.6931472, %v1273_v40  ;;  %v1587_v49 = vadd.f32 %v1531_v19, %v662_v43  ;;  %1278 = vpow2.f32 %v783_v42 }
 0x1e8   : > { %v1000_v51 = vsel %vm997_vm3, %v711_v34, %v983_v41  ;;  %v841_v52 = vadd.f32 1.0, %v1275_v44  ;;  %v844_v54 = vmul.f32 -0.5, %v1275_v44  ;;  %v1277_v57 = vpop.eup %1276  ;;  %v847_v63 = vand.u32 2147483647, %v1275_v44 }
 0x1e9   : > { %1017 = vst.msk [vmem:[%s1560_s21 + $0x10] sm:$0xff] %vm1014_vm4, %v1000_v51  ;;  %v840_v55 = vsel %vm839_vm7, %v837_v47, %v834_v46  ;;  %v747_v48 = vand.u32 2147483647, %v1587_v49  ;;  %v712_v61 = vmul.f32 %v1277_v57, %v1551_v53 }
 0x1ea   : > { %v952_v56 = vadd.f32 %v840_v55, %v728_v45  ;;  %1280 = vlog2.f32 %v841_v52  ;;  %v845_v59 = vadd.f32 1.0, %v844_v54  ;;  %vm848_vm8 = vcmp.lt.f32.partialorder %v847_v63, 0.0004427343 }
 0x1eb   : > { %v763_v60 = vsub.f32 0.0, %v747_v48  ;;  %1282 = vtanh.f32 %v1564_v6  ;;  %v731_v54 = vmax.f32 %v1587_v49, 0.0 }
 0x1ec   : > { %v968_v58 = vmul.f32 10.0, %v952_v56  ;;  %v846_v7 = vmul.f32 %v1275_v44, %v845_v59 }
 0x1ed   : > { %v1279_v1 = vpop.eup %1278  ;;  %v785_v2 = vmul.f32 1.442695, %v763_v60 }
 0x1ee   : > { %v984_v62 = vadd.f32 1e-12, %v968_v58  ;;  %v664_v0 = vpop.f32.mrf.mxu2  ;;  %v850_v8 = vadd.f32 1.0, %v1279_v1  ;;  %v853_v10 = vmul.f32 -0.5, %v1279_v1  ;;  %v856_v21 = vand.u32 2147483647, %v1279_v1 }
 0x1ef   : > { %v1597_v3 = vadd.f32 %v1531_v19, %v664_v0  ;;  %1284 = vpow2.f32 %v785_v2 }
 0x1f0   : > { %v1281_v4 = vpop.eup %1280  ;;  %v1001_v5 = vsel %vm997_vm3, %v712_v61, %v984_v62  ;;  %1286 = vlog2.f32 %v850_v8  ;;  %v854_v17 = vadd.f32 1.0, %v853_v10  ;;  %vm857_vm9 = vcmp.lt.f32.partialorder %v856_v21, 0.0004427343 }
 0x1f1   : > { %1018 = vst.msk [vmem:[%s1560_s21 + $0x18] sm:$0xff] %vm1014_vm4, %v1001_v5  ;;  %v843_v9 = vmul.f32 0.6931472, %v1281_v4  ;;  %v748_v11 = vand.u32 2147483647, %v1597_v3  ;;  %v1283_v16 = vpop.eup %1282  ;;  %1288 = vtanh.f32 %v1575_v28  ;;  %v732_v2 = vmax.f32 %v1597_v3, 0.0 }
 0x1f2   : > { %v713_v25 = vmul.f32 %v1283_v16, %v1551_v53  ;;  %v855_v30 = vmul.f32 %v1279_v1, %v854_v17 }
 0x1f3   : > { %v849_v13 = vsel %vm848_vm8, %v846_v7, %v843_v9  ;;  %v764_v14 = vsub.f32 0.0, %v748_v11 }
 0x1f4   : > { %v953_v15 = vadd.f32 %v849_v13, %v729_v12 }
 0x1f5   : > { %v787_v18 = vmul.f32 1.442695, %v764_v14  ;;  %v1285_v23 = vpop.eup %1284 }
 0x1f6   : > { %v969_v20 = vmul.f32 10.0, %v953_v15  ;;  %v667_v22 = vpop.f32.mrf.mxu2  ;;  %v1287_v6 = vpop.eup %1286  ;;  %v859_v27 = vadd.f32 1.0, %v1285_v23  ;;  %v862_v31 = vmul.f32 -0.5, %v1285_v23  ;;  %v865_v43 = vand.u32 2147483647, %v1285_v23 }
 0x1f7   : > { %1290 = vpow2.f32 %v787_v18  ;;  %v1607_v24 = vadd.f32 %v1531_v19, %v667_v22  ;;  %v852_v29 = vmul.f32 0.6931472, %v1287_v6  ;;  %v1289_v38 = vpop.eup %1288 }
 0x1f8   : > { %v985_v26 = vadd.f32 1e-12, %v969_v20  ;;  %1292 = vlog2.f32 %v859_v27  ;;  %v863_v34 = vadd.f32 1.0, %v862_v31  ;;  %v714_v51 = vmul.f32 %v1289_v38, %v1551_v53 }
 0x1f9   : > { %v749_v32 = vand.u32 2147483647, %v1607_v24  ;;  %v858_v36 = vsel %vm857_vm9, %v855_v30, %v852_v29  ;;  %1294 = vtanh.f32 %v1587_v49  ;;  %vm866_vm10 = vcmp.lt.f32.partialorder %v865_v43, 0.0004427343 }
 0x1fa   : > { %v1002_v33 = vsel %vm997_vm3, %v713_v25, %v985_v26  ;;  %v954_v39 = vadd.f32 %v858_v36, %v730_v35  ;;  %v864_v56 = vmul.f32 %v1285_v23, %v863_v34  ;;  %v733_v35 = vmax.f32 %v1607_v24, 0.0 }
 0x1fb   : > { %1019 = vst.msk [vmem:[%s1560_s21 + $0x20] sm:$0xff] %vm1014_vm4, %v1002_v33  ;;  %v765_v37 = vsub.f32 0.0, %v749_v32 }
 0x1fc   : > { %v970_v42 = vmul.f32 10.0, %v954_v39 }
 0x1fd   : > { %v1291_v40 = vpop.eup %1290  ;;  %v789_v41 = vmul.f32 1.442695, %v765_v37 }
 0x1fe   : > { %v868_v44 = vadd.f32 1.0, %v1291_v40  ;;  %v871_v45 = vmul.f32 -0.5, %v1291_v40  ;;  %v669_v46 = vpop.f32.mrf.mxu2  ;;  %v1293_v47 = vpop.eup %1292  ;;  %v986_v52 = vadd.f32 1e-12, %v970_v42  ;;  %v874_v62 = vand.u32 2147483647, %v1291_v40 }
 0x1ff   : > { %1296 = vpow2.f32 %v789_v41  ;;  %v1618_v28 = vadd.f32 %v1531_v19, %v669_v46  ;;  %v861_v55 = vmul.f32 0.6931472, %v1293_v47  ;;  %v1295_v59 = vpop.eup %1294 }
 0x200   : > { %1298 = vlog2.f32 %v868_v44  ;;  %v1003_v57 = vsel %vm997_vm3, %v714_v51, %v986_v52  ;;  %v872_v48 = vadd.f32 1.0, %v871_v45  ;;  %v715_v12 = vmul.f32 %v1295_v59, %v1551_v53 }
 0x201   : > { %v750_v58 = vand.u32 2147483647, %v1618_v28  ;;  %1020 = vst.msk [vmem:[%s1560_s21 + $0x28] sm:$0xff] %vm1014_vm4, %v1003_v57  ;;  %v867_v60 = vsel %vm866_vm10, %v864_v56, %v861_v55  ;;  %1300 = vtanh.f32 %v1597_v3  ;;  %vm875_vm11 = vcmp.lt.f32.partialorder %v874_v62, 0.0004427343 }
 0x202   : > { %v955_v61 = vadd.f32 %v867_v60, %v731_v54  ;;  %v873_v4 = vmul.f32 %v1291_v40, %v872_v48  ;;  %v734_v48 = vmax.f32 %v1618_v28, 0.0 }
 0x203   : > { %v766_v63 = vsub.f32 0.0, %v750_v58 }
 0x204   : > { %v971_v1 = vmul.f32 10.0, %v955_v61 }
 0x205   : > { %v1297_v0 = vpop.eup %1296  ;;  %v791_v10 = vmul.f32 1.442695, %v766_v63 }
 0x206   : > { %v1299_v49 = vpop.eup %1298  ;;  %v877_v5 = vadd.f32 1.0, %v1297_v0  ;;  %v672_v7 = vpop.f32.mrf.mxu2  ;;  %v880_v9 = vmul.f32 -0.5, %v1297_v0  ;;  %v987_v13 = vadd.f32 1e-12, %v971_v1  ;;  %v883_v21 = vand.u32 2147483647, %v1297_v0 }
 0x207   : > { %v870_v8 = vmul.f32 0.6931472, %v1299_v49  ;;  %v1630_v11 = vadd.f32 %v1531_v19, %v672_v7  ;;  %v1301_v16 = vpop.eup %1300 }
 0x208   : > { %1302 = vlog2.f32 %v877_v5  ;;  %v1004_v3 = vsel %vm997_vm3, %v715_v12, %v987_v13  ;;  %v881_v17 = vadd.f32 1.0, %v880_v9  ;;  %v716_v6 = vmul.f32 %v1301_v16, %v1551_v53 }
 0x209   : > { %v876_v14 = vsel %vm875_vm11, %v873_v4, %v870_v8  ;;  %1304 = vpow2.f32 %v791_v10  ;;  %1021 = vst.msk [vmem:[%s1560_s21 + $0x30] sm:$0xff] %vm1014_vm4, %v1004_v3  ;;  %v751_v18 = vand.u32 2147483647, %v1630_v11  ;;  %vm884_vm12 = vcmp.lt.f32.partialorder %v883_v21, 0.0004427343 }
 0x20a   : > { %v956_v15 = vadd.f32 %v876_v14, %v732_v2  ;;  %1306 = vtanh.f32 %v1607_v24  ;;  %v882_v30 = vmul.f32 %v1297_v0, %v881_v17  ;;  %v735_v14 = vmax.f32 %v1630_v11, 0.0 }
 0x20b   : > { %v767_v22 = vsub.f32 0.0, %v751_v18 }
 0x20c   : > { %v972_v20 = vmul.f32 10.0, %v956_v15 }
 0x20d   : > { %v793_v31 = vmul.f32 1.442695, %v767_v22 }
 0x20e   : > { %v1303_v23 = vpop.eup %1302  ;;  %v988_v25 = vadd.f32 1e-12, %v972_v20  ;;  %v674_v26 = vpop.f32.mrf.mxu2 }
 0x20f   : > { %v1305_v27 = vpop.eup %1304  ;;  %v879_v29 = vmul.f32 0.6931472, %v1303_v23  ;;  %v1641_v32 = vadd.f32 %v1531_v19, %v674_v26  ;;  %1308 = vpow2.f32 %v793_v31 }
 0x210   : > { %v1005_v33 = vsel %vm997_vm3, %v716_v6, %v988_v25  ;;  %v886_v36 = vadd.f32 1.0, %v1305_v27  ;;  %v889_v38 = vmul.f32 -0.5, %v1305_v27  ;;  %v1307_v40 = vpop.eup %1306  ;;  %v892_v24 = vand.u32 2147483647, %v1305_v27 }
 0x211   : > { %1022 = vst.msk [vmem:[%s1560_s21 + $0x38] sm:$0xff] %vm1014_vm4, %v1005_v33  ;;  %v885_v37 = vsel %vm884_vm12, %v882_v30, %v879_v29  ;;  %v752_v34 = vand.u32 2147483647, %v1641_v32  ;;  %v717_v44 = vmul.f32 %v1307_v40, %v1551_v53  ;;  %v736_v33 = vmax.f32 %v1641_v32, 0.0 }
 0x212   : > { %v957_v39 = vadd.f32 %v885_v37, %v733_v35  ;;  %1310 = vlog2.f32 %v886_v36  ;;  %v890_v42 = vadd.f32 1.0, %v889_v38  ;;  %vm893_vm13 = vcmp.lt.f32.partialorder %v892_v24, 0.0004427343 }
 0x213   : > { %v768_v43 = vsub.f32 0.0, %v752_v34  ;;  %1312 = vtanh.f32 %v1618_v28 }
 0x214   : > { %v973_v41 = vmul.f32 10.0, %v957_v39  ;;  %v891_v56 = vmul.f32 %v1305_v27, %v890_v42 }
 0x215   : > { %v1309_v46 = vpop.eup %1308  ;;  %v795_v47 = vmul.f32 1.442695, %v768_v43 }
 0x216   : > { %v989_v45 = vadd.f32 1e-12, %v973_v41  ;;  %v895_v54 = vadd.f32 1.0, %v1309_v46  ;;  %v898_v57 = vmul.f32 -0.5, %v1309_v46  ;;  %v901_v49 = vand.u32 2147483647, %v1309_v46 }
 0x217   : > { %1314 = vpow2.f32 %v795_v47 }
 0x218   : > { %v1311_v51 = vpop.eup %1310  ;;  %v1006_v52 = vsel %vm997_vm3, %v717_v44, %v989_v45  ;;  %1316 = vlog2.f32 %v895_v54  ;;  %v899_v62 = vadd.f32 1.0, %v898_v57  ;;  %vm902_vm14 = vcmp.lt.f32.partialorder %v901_v49, 0.0004427343 }
 0x219   : > { %1023 = vst.msk [vmem:[%s1560_s21 + $0x40] sm:$0xff] %vm1014_vm4, %v1006_v52  ;;  %v888_v55 = vmul.f32 0.6931472, %v1311_v51  ;;  %v1313_v61 = vpop.eup %1312  ;;  %1318 = vtanh.f32 %v1630_v11 }
 0x21a   : > { %v718_v28 = vmul.f32 %v1313_v61, %v1551_v53  ;;  %v900_v9 = vmul.f32 %v1309_v46, %v899_v62 }
 0x21b   : > { %v894_v58 = vsel %vm893_vm13, %v891_v56, %v888_v55 }
 0x21c   : > { %v958_v59 = vadd.f32 %v894_v58, %v734_v48  ;;  %v677_v60 = vpop.f32.mrf.mxu3 }
 0x21d   : > { %v1657_v63 = vadd.f32 %v1531_v19, %v677_v60  ;;  %v1315_v1 = vpop.eup %1314 }
 0x21e   : > { %v974_v0 = vmul.f32 10.0, %v958_v59  ;;  %v1317_v4 = vpop.eup %1316  ;;  %v904_v7 = vadd.f32 1.0, %v1315_v1  ;;  %v907_v10 = vmul.f32 -0.5, %v1315_v1  ;;  %v910_v23 = vand.u32 2147483647, %v1315_v1 }
 0x21f   : > { %v753_v2 = vand.u32 2147483647, %v1657_v63  ;;  %v897_v8 = vmul.f32 0.6931472, %v1317_v4  ;;  %v1319_v18 = vpop.eup %1318  ;;  %v737_v61 = vmax.f32 %v1657_v63, 0.0 }
 0x220   : > { %v990_v5 = vadd.f32 1e-12, %v974_v0  ;;  %1320 = vlog2.f32 %v904_v7  ;;  %v908_v20 = vadd.f32 1.0, %v907_v10  ;;  %v719_v25 = vmul.f32 %v1319_v18, %v1551_v53 }
 0x221   : > { %v769_v12 = vsub.f32 0.0, %v753_v2  ;;  %v903_v3 = vsel %vm902_vm14, %v900_v9, %v897_v8  ;;  %vm911_vm15 = vcmp.lt.f32.partialorder %v910_v23, 0.0004427343 }
 0x222   : > { %v1007_v13 = vsel %vm997_vm3, %v718_v28, %v990_v5  ;;  %v959_v16 = vadd.f32 %v903_v3, %v735_v14  ;;  %v909_v29 = vmul.f32 %v1315_v1, %v908_v20 }
 0x223   : > { %1024 = vst.msk [vmem:[%s1560_s21 + $0x48] sm:$0xff] %vm1014_vm4, %v1007_v13  ;;  %v797_v15 = vmul.f32 1.442695, %v769_v12 }
 0x224   : > { %v679_v17 = vpop.f32.mrf.mxu3  ;;  %v975_v22 = vmul.f32 10.0, %v959_v16 }
 0x225   : > { %1322 = vpow2.f32 %v797_v15  ;;  %v1668_v21 = vadd.f32 %v1531_v19, %v679_v17 }
 0x226   : > { %1324 = vtanh.f32 %v1641_v32  ;;  %v1321_v6 = vpop.eup %1320  ;;  %v991_v26 = vadd.f32 1e-12, %v975_v22 }
 0x227   : > { %v754_v11 = vand.u32 2147483647, %v1668_v21  ;;  %v906_v27 = vmul.f32 0.6931472, %v1321_v6  ;;  %v738_v15 = vmax.f32 %v1668_v21, 0.0 }
 0x228   : > { %v1008_v31 = vsel %vm997_vm3, %v719_v25, %v991_v26 }
 0x229   : > { %v770_v30 = vsub.f32 0.0, %v754_v11  ;;  %1025 = vst.msk [vmem:[%s1560_s21 + $0x50] sm:$0xff] %vm1014_vm4, %v1008_v31  ;;  %v912_v36 = vsel %vm911_vm15, %v909_v29, %v906_v27 }
 0x22a   : > { %v960_v38 = vadd.f32 %v912_v36, %v736_v33 }
 0x22b   : > { %v1323_v35 = vpop.eup %1322  ;;  %v799_v37 = vmul.f32 1.442695, %v770_v30 }
 0x22c   : > { %v913_v39 = vadd.f32 1.0, %v1323_v35  ;;  %v916_v40 = vmul.f32 -0.5, %v1323_v35  ;;  %v682_v34 = vpop.f32.mrf.mxu3  ;;  %v1325_v41 = vpop.eup %1324  ;;  %v976_v43 = vmul.f32 10.0, %v960_v38  ;;  %v919_v51 = vand.u32 2147483647, %v1323_v35 }
 0x22d   : > { %1326 = vpow2.f32 %v799_v37  ;;  %v1679_v42 = vadd.f32 %v1531_v19, %v682_v34  ;;  %v720_v44 = vmul.f32 %v1325_v41, %v1551_v53 }
 0x22e   : > { %1328 = vlog2.f32 %v913_v39  ;;  %v992_v45 = vadd.f32 1e-12, %v976_v43  ;;  %v917_v24 = vadd.f32 1.0, %v916_v40  ;;  %vm920_vm0 = vcmp.lt.f32.partialorder %v919_v51, 0.0004427343 }
 0x22f   : > { %v755_v32 = vand.u32 2147483647, %v1679_v42  ;;  %1330 = vtanh.f32 %v1657_v63  ;;  %v739_v33 = vmax.f32 %v1679_v42, 0.0 }
 0x230   : > { %v1009_v47 = vsel %vm997_vm3, %v720_v44, %v992_v45  ;;  %v918_v56 = vmul.f32 %v1323_v35, %v917_v24 }
 0x231   : > { %v771_v46 = vsub.f32 0.0, %v755_v32  ;;  %1026 = vst.msk [vmem:[%s1560_s21 + $0x58] sm:$0xff] %vm1014_vm4, %v1009_v47 }
 0x233   : > { %v1327_v52 = vpop.eup %1326  ;;  %v801_v54 = vmul.f32 1.442695, %v771_v46 }
 0x234   : > { %v1329_v55 = vpop.eup %1328  ;;  %v922_v57 = vadd.f32 1.0, %v1327_v52  ;;  %v684_v48 = vpop.f32.mrf.mxu3  ;;  %v925_v59 = vmul.f32 -0.5, %v1327_v52  ;;  %v928_v5 = vand.u32 2147483647, %v1327_v52 }
 0x235   : > { %v915_v58 = vmul.f32 0.6931472, %v1329_v55  ;;  %1332 = vpow2.f32 %v801_v54  ;;  %v1689_v60 = vadd.f32 %v1531_v19, %v684_v48  ;;  %v1331_v1 = vpop.eup %1330 }
 0x236   : > { %1334 = vlog2.f32 %v922_v57  ;;  %v926_v2 = vadd.f32 1.0, %v925_v59  ;;  %v721_v9 = vmul.f32 %v1331_v1, %v1551_v53  ;;  %vm929_vm1 = vcmp.lt.f32.partialorder %v928_v5, 0.0004427343 }
 0x237   : > { %v921_v62 = vsel %vm920_vm0, %v918_v56, %v915_v58  ;;  %v756_v0 = vand.u32 2147483647, %v1689_v60  ;;  %1336 = vtanh.f32 %v1668_v21  ;;  %v740_v45 = vmax.f32 %v1689_v60, 0.0 }
 0x238   : > { %v961_v49 = vadd.f32 %v921_v62, %v737_v61  ;;  %v927_v13 = vmul.f32 %v1327_v52, %v926_v2 }
 0x239   : > { %v772_v4 = vsub.f32 0.0, %v756_v0 }
 0x23a   : > { %v977_v28 = vmul.f32 10.0, %v961_v49 }
 0x23b   : > { %v1333_v7 = vpop.eup %1332  ;;  %v803_v8 = vmul.f32 1.442695, %v772_v4 }
 0x23c   : > { %v1335_v19 = vpop.eup %1334  ;;  %v993_v63 = vadd.f32 1e-12, %v977_v28  ;;  %v931_v10 = vadd.f32 1.0, %v1333_v7  ;;  %v934_v14 = vmul.f32 -0.5, %v1333_v7  ;;  %v937_v23 = vand.u32 2147483647, %v1333_v7 }
 0x23d   : > { %v924_v12 = vmul.f32 0.6931472, %v1335_v19  ;;  %1338 = vpow2.f32 %v803_v8  ;;  %v1337_v18 = vpop.eup %1336 }
 0x23e   : > { %v1010_v3 = vsel %vm997_vm3, %v721_v9, %v993_v63  ;;  %1340 = vlog2.f32 %v931_v10  ;;  %v935_v20 = vadd.f32 1.0, %v934_v14  ;;  %v722_v25 = vmul.f32 %v1337_v18, %v1551_v53 }
 0x23f   : > { %1027 = vst.msk [vmem:[%s1560_s21 + $0x60] sm:$0xff] %vm1014_vm4, %v1010_v3  ;;  %v930_v16 = vsel %vm929_vm1, %v927_v13, %v924_v12  ;;  %1342 = vtanh.f32 %v1679_v42  ;;  %vm938_vm2 = vcmp.lt.f32.partialorder %v937_v23, 0.0004427343 }
 0x240   : > { %v962_v17 = vadd.f32 %v930_v16, %v738_v15  ;;  %v936_v29 = vmul.f32 %v1333_v7, %v935_v20 }
 0x242   : > { %v978_v22 = vmul.f32 10.0, %v962_v17 }
 0x243   : > { %v1339_v11 = vpop.eup %1338 }
 0x244   : > { %v1341_v6 = vpop.eup %1340  ;;  %v994_v26 = vadd.f32 1e-12, %v978_v22  ;;  %v940_v27 = vadd.f32 1.0, %v1339_v11  ;;  %v943_v30 = vmul.f32 -0.5, %v1339_v11  ;;  %v946_v40 = vand.u32 2147483647, %v1339_v11 }
 0x245   : > { %v933_v21 = vmul.f32 0.6931472, %v1341_v6  ;;  %v1343_v37 = vpop.eup %1342 }
 0x246   : > { %v1011_v31 = vsel %vm997_vm3, %v722_v25, %v994_v26  ;;  %1344 = vlog2.f32 %v940_v27  ;;  %v944_v38 = vadd.f32 1.0, %v943_v30  ;;  %v723_v41 = vmul.f32 %v1343_v37, %v1551_v53 }
 0x247   : > { %1028 = vst.msk [vmem:[%s1560_s21 + $0x68] sm:$0xff] %vm1014_vm4, %v1011_v31  ;;  %v939_v35 = vsel %vm938_vm2, %v936_v29, %v933_v21  ;;  %1346 = vtanh.f32 %v1689_v60  ;;  %vm947_vm5 = vcmp.lt.f32.partialorder %v946_v40, 0.0004427343 }
 0x248   : > { %v963_v36 = vadd.f32 %v939_v35, %v739_v33  ;;  %v945_v42 = vmul.f32 %v1339_v11, %v944_v38 }
 0x24a   : > { %v979_v39 = vmul.f32 10.0, %v963_v36 }
 0x24c   : > { %v1345_v34 = vpop.eup %1344  ;;  %v995_v43 = vadd.f32 1e-12, %v979_v39 }
 0x24d   : > { %v942_v32 = vmul.f32 0.6931472, %v1345_v34  ;;  %v1347_v47 = vpop.eup %1346 }
 0x24e   : > { %v1012_v44 = vsel %vm997_vm3, %v723_v41, %v995_v43  ;;  %v724_v52 = vmul.f32 %v1347_v47, %v1551_v53 }
 0x24f   : > { %1029 = vst.msk [vmem:[%s1560_s21 + $0x70] sm:$0xff] %vm1014_vm4, %v1012_v44  ;;  %v948_v24 = vsel %vm947_vm5, %v945_v42, %v942_v32 }
 0x250   : > { %v964_v46 = vadd.f32 %v948_v24, %v740_v45 }
 0x252   : > { %v980_v51 = vmul.f32 10.0, %v964_v46 }
 0x254   : > { %v996_v54 = vadd.f32 1e-12, %v980_v51 }
 0x256   : > { %v1013_v55 = vsel %vm997_vm3, %v724_v52, %v996_v54 }
 0x257   : > { %1030 = vst.msk [vmem:[%s1560_s21 + $0x78] sm:$0xff] %vm1014_vm4, %v1013_v55 }
 0x258 PF: > { %s18_s27 = sadd.s32 1, %s1354_s27  }
 0x259   : > { %p15_p4 = scmp.ge.s32.totalorder %s18_s27, 4  }
 0x25b   :  { %17 = sbr.rel (!%p15_p4) target bundleno = 1 (0x1), region = 82 }

</bundles_post_ra>
